<compile_context>
chip_gen: v6e
topology: v6e:2x2x1
jax: 0.10.0
libtpu: 0.0.40
codegen_flags: <defaults>
</compile_context>

<pallas_src>
import math

import jax
import jax.numpy as jnp
from jax.experimental import pallas as pl
from jax.experimental.pallas import tpu as pltpu


def _round_up(x, m):
    return (x + m - 1) // m * m


def _make_actor_kernel(log_std_min, log_std_max, act_limit):
    """Returns a kernel closure with the static scalars baked in."""
    half_log_2pi = 0.5 * math.log(2.0 * math.pi)
    two_log2 = 2.0 * math.log(2.0)

    def kernel(obs_ref, w1_ref, b1_ref, w2_ref, b2_ref,
               wh_ref, bh_ref, noise_ref, out_ref):
        act_dim = noise_ref.shape[0]

        # Trunk: two Linear+ReLU layers, feature-major (features x TB lanes).
        x = obs_ref[...]                                                  # (obs_dim, TB)
        h1 = jnp.dot(w1_ref[...], x, preferred_element_type=jnp.float32) + b1_ref[...]
        h1 = jnp.maximum(h1, 0.0)                                         # (hidden, TB)
        h2 = jnp.dot(w2_ref[...], h1, preferred_element_type=jnp.float32) + b2_ref[...]
        h2 = jnp.maximum(h2, 0.0)                                         # (hidden, TB)

        # Fused mu / log_std heads: one matmul, sublane-aligned static split.
        heads = jnp.dot(wh_ref[...], h2, preferred_element_type=jnp.float32) + bh_ref[...]
        mu = heads[:act_dim, :]                                           # (act_dim, TB)
        log_std = jnp.clip(heads[act_dim:, :], log_std_min, log_std_max)  # (act_dim, TB)
        std = jnp.exp(log_std)

        # rsample: action = mu + std * eps  (eps = 0 rows => deterministic path).
        eps = noise_ref[...]                                              # (act_dim, TB)
        action = mu + std * eps

        # Normal(mu, std).log_prob(action).sum(axis) with (action - mu)/std == eps,
        # plus the SAC tanh-squash correction, folded into one sublane reduction:
        #   -0.5*eps^2 - log_std - 0.5*log(2pi) - 2*log(2) + 2*a + 2*softplus(-2a)
        per_dim = (-0.5 * eps * eps - log_std - (half_log_2pi + two_log2)
                   + 2.0 * action + 2.0 * jax.nn.softplus(-2.0 * action))
        logp = jnp.sum(per_dim, axis=0, keepdims=True)                    # (1, TB)

        squashed = act_limit * jnp.tanh(action)                           # (act_dim, TB)

        # Single dense store of the packed (act_dim+1, TB) result block.
        out_ref[...] = jnp.concatenate([squashed, logp], axis=0).astype(out_ref.dtype)

    return kernel


def _choose_tile(batch, block_b):
    """Lane tile (multiple of 128) and padded batch; >=2 grid steps when possible."""
    b128 = _round_up(max(batch, 1), 128)
    tb = min(_round_up(block_b, 128), b128)
    if b128 >= 2 * 128:
        # Keep at least 2 grid steps so v7x megacore can split the batch.
        tb = min(tb, _round_up(b128, 2 * 128) // 2)
    b_pad = _round_up(max(batch, 1), tb)
    return tb, b_pad


def tanh_gaussian_actor_forward(obs, params, noise, *,
                                log_std_min, log_std_max, act_limit,
                                block_b=2048):
    """Full actor forward in one Pallas call, tiled over the batch (lane) axis.

    obs:    (B, obs_dim) f32        noise: (B, act_dim) f32 (zeros => deterministic)
    params: w1 (hidden, obs_dim), w2 (hidden, hidden), wh (2*act_dim, hidden)
            b1/b2 (hidden, 1), bh (2*act_dim, 1)   -- PyTorch (out, in) layout.
    Returns action (B, act_dim) f32 and logp (B,) f32.
    """
    B, obs_dim = obs.shape
    hidden = params["w1"].shape[0]
    act_dim = params["wh"].shape[0] // 2

    tb, b_pad = _choose_tile(B, block_b)

    # Feature-major inputs: batch on the lane axis, padded to the tile grid.
    obs_t = jnp.pad(obs.astype(jnp.float32).T, ((0, 0), (0, b_pad - B)))
    noise_t = jnp.pad(noise.astype(jnp.float32).T, ((0, 0), (0, b_pad - B)))

    w1 = params["w1"].astype(jnp.float32)
    w2 = params["w2"].astype(jnp.float32)
    wh = params["wh"].astype(jnp.float32)
    b1 = params["b1"].astype(jnp.float32)
    b2 = params["b2"].astype(jnp.float32)
    bh = params["bh"].astype(jnp.float32)

    kernel = _make_actor_kernel(float(log_std_min), float(log_std_max), float(act_limit))

    resident = lambda i: (0, 0)   # weights/biases stay VMEM-resident across steps
    batched = lambda i: (0, i)    # obs/noise/output tiled over the batch (lane) axis

    packed = pl.pallas_call(
        kernel,
        out_shape=jax.ShapeDtypeStruct((act_dim + 1, b_pad), jnp.float32),
        grid=(b_pad // tb,),
        in_specs=[
            pl.BlockSpec((obs_dim, tb), batched),            # obs (feature-major)
            pl.BlockSpec((hidden, obs_dim), resident),       # w1
            pl.BlockSpec((hidden, 1), resident),             # b1
            pl.BlockSpec((hidden, hidden), resident),        # w2
            pl.BlockSpec((hidden, 1), resident),             # b2
            pl.BlockSpec((2 * act_dim, hidden), resident),   # fused heads W
            pl.BlockSpec((2 * act_dim, 1), resident),        # fused heads b
            pl.BlockSpec((act_dim, tb), batched),            # rsample noise
        ],
        out_specs=pl.BlockSpec((act_dim + 1, tb), batched),
        compiler_params=pltpu.CompilerParams(
            dimension_semantics=("parallel",)),
    )(obs_t, w1, b1, w2, b2, wh, bh, noise_t)

    action = packed[:act_dim, :B].T          # (B, act_dim)
    logp = packed[act_dim, :B]               # (B,)
    return action, logp


# ----------------------------- reference & init -----------------------------

def _xavier_uniform(key, out_features, in_features, gain):
    bound = gain * math.sqrt(6.0 / (in_features + out_features))
    return jax.random.uniform(key, (out_features, in_features), jnp.float32, -bound, bound)


def init_params(key, obs_dim, act_dim, hidden):
    gain = 1.414  # matches weights_init_ in the PyTorch module
    k1, k2, k3, k4 = jax.random.split(key, 4)
    wmu = _xavier_uniform(k3, act_dim, hidden, gain)
    wls = _xavier_uniform(k4, act_dim, hidden, gain)
    return {
        "w1": _xavier_uniform(k1, hidden, obs_dim, gain),
        "b1": jnp.zeros((hidden, 1), jnp.float32),
        "w2": _xavier_uniform(k2, hidden, hidden, gain),
        "b2": jnp.zeros((hidden, 1), jnp.float32),
        # mu / log_std heads fused: rows [0:act_dim]=mu, [act_dim:2*act_dim]=log_std
        "wh": jnp.concatenate([wmu, wls], axis=0),
        "bh": jnp.zeros((2 * act_dim, 1), jnp.float32),
    }


def reference_forward(obs, params, noise, *, log_std_min, log_std_max, act_limit):
    """Pure-JAX reference mirroring the PyTorch forward (with_logprob=True)."""
    act_dim = noise.shape[1]
    h1 = jax.nn.relu(obs @ params["w1"].T + params["b1"][:, 0])
    h2 = jax.nn.relu(h1 @ params["w2"].T + params["b2"][:, 0])
    heads = h2 @ params["wh"].T + params["bh"][:, 0]
    mu = heads[:, :act_dim]
    log_std = jnp.clip(heads[:, act_dim:], log_std_min, log_std_max)
    std = jnp.exp(log_std)
    action = mu + std * noise
    logp = jnp.sum(-0.5 * ((action - mu) / std) ** 2 - log_std
                   - 0.5 * math.log(2.0 * math.pi), axis=-1)
    logp = logp - jnp.sum(2.0 * (math.log(2.0) - action
                                 - jax.nn.softplus(-2.0 * action)), axis=-1)
    return act_limit * jnp.tanh(action), logp


if __name__ == "__main__":
    # Small shapes consistent with the module: obs_dim=16, act_dim=8, hidden=32, batch=2.
    B, OBS_DIM, ACT_DIM, HIDDEN = 2, 16, 8, 32
    LOG_STD_MIN, LOG_STD_MAX = -20.0, 2.0
    ACT_LIMIT = 1.0

    root = jax.random.PRNGKey(0)
    k_obs, k_params, k_noise = jax.random.split(root, 3)

    obs = jax.random.normal(k_obs, (B, OBS_DIM), jnp.float32)
    params = init_params(k_params, OBS_DIM, ACT_DIM, HIDDEN)
    # rsample noise (stochastic path); pass zeros here for deterministic=True semantics.
    noise = jax.random.normal(k_noise, (B, ACT_DIM), jnp.float32)

    action, logp = tanh_gaussian_actor_forward(
        obs, params, noise,
        log_std_min=LOG_STD_MIN, log_std_max=LOG_STD_MAX, act_limit=ACT_LIMIT,
    )
    jax.block_until_ready((action, logp))

    assert action.shape == (B, ACT_DIM) and logp.shape == (B,)
    assert bool(jnp.all(jnp.isfinite(action))) and bool(jnp.all(jnp.isfinite(logp)))

    # Tolerance-asserted pure-JAX reference (f32 end-to-end, so tight tolerances hold).
    ref_action, ref_logp = reference_forward(
        obs, params, noise,
        log_std_min=LOG_STD_MIN, log_std_max=LOG_STD_MAX, act_limit=ACT_LIMIT,
    )
    assert bool(jnp.allclose(action, ref_action, atol=2e-3, rtol=2e-3))
    assert bool(jnp.allclose(logp, ref_logp, atol=2e-3, rtol=2e-3))

    print("KERNEL_OK")
</pallas_src>

<mosaic_0001>
module attributes {stable_mosaic.version = 11 : i64} {
  func.func @kernel(%arg0: i32, %arg1: memref<16x128xf32, #tpu.memory_space<vmem>>, %arg2: memref<32x16xf32, #tpu.memory_space<vmem>>, %arg3: memref<32x1xf32, #tpu.memory_space<vmem>>, %arg4: memref<32x32xf32, #tpu.memory_space<vmem>>, %arg5: memref<32x1xf32, #tpu.memory_space<vmem>>, %arg6: memref<16x32xf32, #tpu.memory_space<vmem>>, %arg7: memref<16x1xf32, #tpu.memory_space<vmem>>, %arg8: memref<8x128xf32, #tpu.memory_space<vmem>>, %arg9: memref<9x128xf32, #tpu.memory_space<vmem>>) attributes {dimension_semantics = [#tpu.dimension_semantics<parallel>], iteration_bounds = array<i64: 1>, scalar_prefetch = 0 : i64, scratch_operands = 0 : i64, tpu.core_type = #tpu.core_type<tc>, window_params = [{transform_indices = @transform_0, window_bounds = array<i64: 16, 128>}, {pipeline_mode = #tpu.pipeline_mode<synchronous>, transform_indices = @transform_1, window_bounds = array<i64: 32, 16>}, {pipeline_mode = #tpu.pipeline_mode<synchronous>, transform_indices = @transform_2, window_bounds = array<i64: 32, 1>}, {pipeline_mode = #tpu.pipeline_mode<synchronous>, transform_indices = @transform_3, window_bounds = array<i64: 32, 32>}, {pipeline_mode = #tpu.pipeline_mode<synchronous>, transform_indices = @transform_4, window_bounds = array<i64: 32, 1>}, {pipeline_mode = #tpu.pipeline_mode<synchronous>, transform_indices = @transform_5, window_bounds = array<i64: 16, 32>}, {pipeline_mode = #tpu.pipeline_mode<synchronous>, transform_indices = @transform_6, window_bounds = array<i64: 16, 1>}, {transform_indices = @transform_7, window_bounds = array<i64: 8, 128>}, {transform_indices = @transform_8, window_bounds = array<i64: 9, 128>}]} {
    %c0 = arith.constant 0 : index
    %c0_0 = arith.constant 0 : index
    %0 = vector.load %arg1[%c0, %c0_0] : memref<16x128xf32, #tpu.memory_space<vmem>>, vector<16x128xf32>
    %c0_1 = arith.constant 0 : index
    %c0_2 = arith.constant 0 : index
    %1 = vector.load %arg2[%c0_1, %c0_2] : memref<32x16xf32, #tpu.memory_space<vmem>>, vector<32x16xf32>
    %cst = arith.constant dense<0.000000e+00> : vector<32x128xf32>
    %2 = tpu.matmul %1, %0, %cst {dimension_numbers = #tpu.dot_dimension_numbers<[1], [0], [0], [1], [0, 0, 1, 1], [], []>} : vector<32x16xf32>, vector<16x128xf32>, vector<32x128xf32> -> vector<32x128xf32>
    %c0_3 = arith.constant 0 : index
    %c0_4 = arith.constant 0 : index
    %3 = vector.load %arg3[%c0_3, %c0_4] : memref<32x1xf32, #tpu.memory_space<vmem>>, vector<32x1xf32>
    %4 = vector.broadcast %3 : vector<32x1xf32> to vector<32x128xf32>
    %5 = arith.addf %2, %4 : vector<32x128xf32>
    %cst_5 = arith.constant 0.000000e+00 : f32
    %6 = vector.broadcast %cst_5 : f32 to vector<32x128xf32>
    %7 = arith.maximumf %5, %6 : vector<32x128xf32>
    %c0_6 = arith.constant 0 : index
    %c0_7 = arith.constant 0 : index
    %8 = vector.load %arg4[%c0_6, %c0_7] : memref<32x32xf32, #tpu.memory_space<vmem>>, vector<32x32xf32>
    %cst_8 = arith.constant dense<0.000000e+00> : vector<32x128xf32>
    %9 = tpu.matmul %8, %7, %cst_8 {dimension_numbers = #tpu.dot_dimension_numbers<[1], [0], [0], [1], [0, 0, 1, 1], [], []>} : vector<32x32xf32>, vector<32x128xf32>, vector<32x128xf32> -> vector<32x128xf32>
    %c0_9 = arith.constant 0 : index
    %c0_10 = arith.constant 0 : index
    %10 = vector.load %arg5[%c0_9, %c0_10] : memref<32x1xf32, #tpu.memory_space<vmem>>, vector<32x1xf32>
    %11 = vector.broadcast %10 : vector<32x1xf32> to vector<32x128xf32>
    %12 = arith.addf %9, %11 : vector<32x128xf32>
    %cst_11 = arith.constant 0.000000e+00 : f32
    %13 = vector.broadcast %cst_11 : f32 to vector<32x128xf32>
    %14 = arith.maximumf %12, %13 : vector<32x128xf32>
    %c0_12 = arith.constant 0 : index
    %c0_13 = arith.constant 0 : index
    %15 = vector.load %arg6[%c0_12, %c0_13] : memref<16x32xf32, #tpu.memory_space<vmem>>, vector<16x32xf32>
    %cst_14 = arith.constant dense<0.000000e+00> : vector<16x128xf32>
    %16 = tpu.matmul %15, %14, %cst_14 {dimension_numbers = #tpu.dot_dimension_numbers<[1], [0], [0], [1], [0, 0, 1, 1], [], []>} : vector<16x32xf32>, vector<32x128xf32>, vector<16x128xf32> -> vector<16x128xf32>
    %c0_15 = arith.constant 0 : index
    %c0_16 = arith.constant 0 : index
    %17 = vector.load %arg7[%c0_15, %c0_16] : memref<16x1xf32, #tpu.memory_space<vmem>>, vector<16x1xf32>
    %18 = vector.broadcast %17 : vector<16x1xf32> to vector<16x128xf32>
    %19 = arith.addf %16, %18 : vector<16x128xf32>
    %20 = vector.extract_strided_slice %19 {offsets = [0, 0], sizes = [8, 128], strides = [1, 1]} : vector<16x128xf32> to vector<8x128xf32>
    %21 = vector.extract_strided_slice %19 {offsets = [8, 0], sizes = [8, 128], strides = [1, 1]} : vector<16x128xf32> to vector<8x128xf32>
    %cst_17 = arith.constant -2.000000e+01 : f32
    %cst_18 = arith.constant 2.000000e+00 : f32
    %22 = vector.broadcast %cst_17 : f32 to vector<8x128xf32>
    %23 = arith.maximumf %22, %21 : vector<8x128xf32>
    %24 = vector.broadcast %cst_18 : f32 to vector<8x128xf32>
    %25 = arith.minimumf %24, %23 : vector<8x128xf32>
    %26 = math.exp %25 : vector<8x128xf32>
    %c0_19 = arith.constant 0 : index
    %c0_20 = arith.constant 0 : index
    %27 = vector.load %arg8[%c0_19, %c0_20] : memref<8x128xf32, #tpu.memory_space<vmem>>, vector<8x128xf32>
    %28 = arith.mulf %26, %27 : vector<8x128xf32>
    %29 = arith.addf %20, %28 : vector<8x128xf32>
    %cst_21 = arith.constant -5.000000e-01 : f32
    %30 = vector.broadcast %cst_21 : f32 to vector<8x128xf32>
    %31 = arith.mulf %30, %27 : vector<8x128xf32>
    %32 = arith.mulf %31, %27 : vector<8x128xf32>
    %33 = arith.subf %32, %25 : vector<8x128xf32>
    %cst_22 = arith.constant 2.305233 : f32
    %34 = vector.broadcast %cst_22 : f32 to vector<8x128xf32>
    %35 = arith.subf %33, %34 : vector<8x128xf32>
    %cst_23 = arith.constant 2.000000e+00 : f32
    %36 = vector.broadcast %cst_23 : f32 to vector<8x128xf32>
    %37 = arith.mulf %36, %29 : vector<8x128xf32>
    %38 = arith.addf %35, %37 : vector<8x128xf32>
    %cst_24 = arith.constant -2.000000e+00 : f32
    %39 = vector.broadcast %cst_24 : f32 to vector<8x128xf32>
    %40 = arith.mulf %39, %29 : vector<8x128xf32>
    %cst_25 = arith.constant 0.000000e+00 : f32
    %41 = vector.broadcast %cst_25 : f32 to vector<8x128xf32>
    %42 = arith.maximumf %40, %41 : vector<8x128xf32>
    %43 = vector.broadcast %cst_25 : f32 to vector<8x128xf32>
    %44 = arith.subf %40, %43 : vector<8x128xf32>
    %45 = arith.cmpf one, %44, %44 : vector<8x128xf32>
    %46 = vector.broadcast %cst_25 : f32 to vector<8x128xf32>
    %47 = arith.addf %40, %46 : vector<8x128xf32>
    %48 = math.absf %44 : vector<8x128xf32>
    %cst_26 = arith.constant 0.000000e+00 : f32
    %49 = vector.broadcast %cst_26 : f32 to vector<8x128xf32>
    %50 = arith.subf %49, %48 : vector<8x128xf32>
    %51 = math.exp %50 : vector<8x128xf32>
    %52 = math.log1p %51 : vector<8x128xf32>
    %53 = arith.addf %42, %52 : vector<8x128xf32>
    %54 = arith.select %45, %47, %53 : vector<8x128xi1>, vector<8x128xf32>
    %cst_27 = arith.constant 2.000000e+00 : f32
    %55 = vector.broadcast %cst_27 : f32 to vector<8x128xf32>
    %56 = arith.mulf %55, %54 : vector<8x128xf32>
    %57 = arith.addf %38, %56 : vector<8x128xf32>
    %cst_28 = arith.constant dense<0.000000e+00> : vector<128xf32>
    %58 = vector.multi_reduction <add>, %57, %cst_28 [0] : vector<8x128xf32> to vector<128xf32>
    %59 = vector.shape_cast %58 : vector<128xf32> to vector<1x128xf32>
    %60 = math.tanh %29 : vector<8x128xf32>
    %cst_29 = arith.constant 1.000000e+00 : f32
    %61 = vector.broadcast %cst_29 : f32 to vector<8x128xf32>
    %62 = arith.mulf %61, %60 : vector<8x128xf32>
    %63 = tpu.concatenate %62, %59 in 0 : vector<8x128xf32>, vector<1x128xf32> -> vector<9x128xf32>
    %c0_30 = arith.constant 0 : index
    %c0_31 = arith.constant 0 : index
    %64 = vector.load %arg9[%c0_30, %c0_31] : memref<9x128xf32, #tpu.memory_space<vmem>>, vector<9x128xf32>
    tpu.vector_store %arg9[%c0_30, %c0_31], %63 {strides = array<i32>} : memref<9x128xf32, #tpu.memory_space<vmem>>, vector<9x128xf32>,
    return
  }
  func.func @transform_0(%arg0: i32) -> (i32, i32) {
    %c0_i32 = arith.constant 0 : i32
    %c0_i32_0 = arith.constant 0 : i32
    return %c0_i32, %arg0 : i32, i32
  }
  func.func @transform_1(%arg0: i32) -> (i32, i32) {
    %c0_i32 = arith.constant 0 : i32
    %c0_i32_0 = arith.constant 0 : i32
    %c0_i32_1 = arith.constant 0 : i32
    return %c0_i32, %c0_i32_0 : i32, i32
  }
  func.func @transform_2(%arg0: i32) -> (i32, i32) {
    %c0_i32 = arith.constant 0 : i32
    %c0_i32_0 = arith.constant 0 : i32
    %c0_i32_1 = arith.constant 0 : i32
    return %c0_i32, %c0_i32_0 : i32, i32
  }
  func.func @transform_3(%arg0: i32) -> (i32, i32) {
    %c0_i32 = arith.constant 0 : i32
    %c0_i32_0 = arith.constant 0 : i32
    %c0_i32_1 = arith.constant 0 : i32
    return %c0_i32, %c0_i32_0 : i32, i32
  }
  func.func @transform_4(%arg0: i32) -> (i32, i32) {
    %c0_i32 = arith.constant 0 : i32
    %c0_i32_0 = arith.constant 0 : i32
    %c0_i32_1 = arith.constant 0 : i32
    return %c0_i32, %c0_i32_0 : i32, i32
  }
  func.func @transform_5(%arg0: i32) -> (i32, i32) {
    %c0_i32 = arith.constant 0 : i32
    %c0_i32_0 = arith.constant 0 : i32
    %c0_i32_1 = arith.constant 0 : i32
    return %c0_i32, %c0_i32_0 : i32, i32
  }
  func.func @transform_6(%arg0: i32) -> (i32, i32) {
    %c0_i32 = arith.constant 0 : i32
    %c0_i32_0 = arith.constant 0 : i32
    %c0_i32_1 = arith.constant 0 : i32
    return %c0_i32, %c0_i32_0 : i32, i32
  }
  func.func @transform_7(%arg0: i32) -> (i32, i32) {
    %c0_i32 = arith.constant 0 : i32
    %c0_i32_0 = arith.constant 0 : i32
    return %c0_i32, %arg0 : i32, i32
  }
  func.func @transform_8(%arg0: i32) -> (i32, i32) {
    %c0_i32 = arith.constant 0 : i32
    %c0_i32_0 = arith.constant 0 : i32
    return %c0_i32, %arg0 : i32, i32
  }
}

</mosaic_0001>

<bundles_post_ra>
// kernel: tpu_custom_call.1
= control target key start
LH: loop header
LB: loop body
LE: loop exit
PB: predicated region body
PF: predicated region fallthrough
CT: control target
= control target key end

     0   :  { %vm60_vm0 = vcmask 130048   ;;  %v548_v4 = vmov 0   ;;  %s679_s0 = inlined_call_operand.vmem [shape: f32[16,128], index: 0, kind: input, shape index: {}]   ;;  %s680_s1 = inlined_call_operand.vmem [shape: f32[32,16], index: 1, kind: input, shape index: {}]   ;;  %s681_s2 = inlined_call_operand.vmem [shape: f32[32,1], index: 2, kind: input, shape index: {}]   ;;  %s682_s3 = inlined_call_operand.vmem [shape: f32[32,32], index: 3, kind: input, shape index: {}]   ;;  %s683_s4 = inlined_call_operand.vmem [shape: f32[32,1], index: 4, kind: input, shape index: {}]   ;;  %s684_s5 = inlined_call_operand.vmem [shape: f32[16,32], index: 5, kind: input, shape index: {}]   ;;  %s685_s6 = inlined_call_operand.vmem [shape: f32[16,1], index: 6, kind: input, shape index: {}]   ;;  %s686_s7 = inlined_call_operand.vmem [shape: f32[8,128], index: 7, kind: input, shape index: {}]   ;;  %s687_s8 = inlined_call_operand.hbm [shape: f32[9,128], index: 8, kind: output, shape index: {}]  }
   0x1   :  { %v31_v0 = vld [vmem:[%s679_s0 + $0x8] sm:$0xff]  ;;  %v30_v1 = vld [vmem:[%s679_s0] sm:$0xff]  ;;  %516 = vset.pattern.permute.xlu0 %v548_v4  ;;  %v39_v5 = vld [vmem:[%s681_s2 + $0x18] sm:$0xff]  ;;  %517 = vset.pattern.permute.xlu1 %v548_v4 }
   0x2   :  { %v32_v2 = vld [vmem:[%s680_s1] sm:$0xff]  ;;  %477 = vmatprep.subr.mxu0 %v31_v0  ;;  %v33_v3 = vld [vmem:[%s680_s1 + $0x8] sm:$0xff]  ;;  %v34_v7 = vld [vmem:[%s680_s1 + $0x10] sm:$0xff]  ;;  %57 = vperm.xlu0 %516, %v39_v5  }
   0x3   :  { %481 = vmatprep.mubr.msk.f32.mxu0 %vm60_vm0, %v32_v2  ;;  %478 = vmatpush3.msra.mxu0 %v31_v0  ;;  %v37_v6 = vld [vmem:[%s681_s2 + $0x8] sm:$0xff]  ;;  %v38_v8 = vld [vmem:[%s681_s2 + $0x10] sm:$0xff] }
   0x4   :  { %479 = vmatprep.subr.mxu0 %v30_v1  ;;  %47 = vperm.xlu1 %517, %v37_v6  }
   0x5   :  { %480 = vmatpush3.msra.mxu0 %v30_v1 }
   0x6   :  { %482 = vmatmul.mubr.msk.f32.vlgmr.msra.gmra.mxu0 %vm60_vm0, %v33_v3 }
   0x7   :  { %13 = vsyncpa [#allocation3], 0  ;;  %484 = vmatprep.mubr.msk.f32.mxu0 %vm60_vm0, %v34_v7  ;;  %v35_v9 = vld [vmem:[%s680_s1 + $0x18] sm:$0xff]  ;;  %v36_v10 = vld [vmem:[%s681_s2] sm:$0xff]  ;;  %52 = vperm.xlu0 %516, %v38_v8   ;;  %vm190_vm1 = vcmask 261120  }
   0x8   :  { %v169_v11 = vld [vmem:[%s683_s4 + $0x18] sm:$0xff]  ;;  %42 = vperm.xlu1 %517, %v36_v10   ;;  %v168_v12 = vld [vmem:[%s683_s4 + $0x10] sm:$0xff]  ;;  %v167_v13 = vld [vmem:[%s683_s4 + $0x8] sm:$0xff] }
   0x9   :  { %v166_v14 = vld [vmem:[%s683_s4] sm:$0xff]  ;;  %v295_v15 = vld [vmem:[%s685_s6 + $0x8] sm:$0xff]  ;;  %v164_v35 = vld [vmem:[%s682_s3 + $0x10] sm:$0xff] }
   0xa   :  { %485 = vmatmul.mubr.msk.f32.gmra.mxu0 %vm60_vm0, %v35_v9  ;;  %v294_v16 = vld [vmem:[%s685_s6] sm:$0xff]  ;;  %v163_v34 = vld [vmem:[%s682_s3 + $0x8] sm:$0xff]  ;;  %v165_v36 = vld [vmem:[%s682_s3 + $0x18] sm:$0xff] }
   0xb   :  { %187 = vperm.xlu0 %516, %v169_v11   ;;  %v162_v17 = vld [vmem:[%s682_s3] sm:$0xff]  ;;  %v293_v54 = vld [vmem:[%s684_s5 + $0x8] sm:$0xff] }
   0xc   :  { %182 = vperm.xlu1 %517, %v168_v12   ;;  %495 = vmatprep.mubr.msk.f32.mxu1 %vm190_vm1, %v162_v17  ;;  %v292_v37 = vld [vmem:[%s684_s5] sm:$0xff]  ;;  %s549_s5 = smov [#allocation2]  }
   0xd   :  { %509 = vmatprep.mubr.msk.f32.mxu0 %vm190_vm1, %v292_v37  ;;  %v391_v0 = vld [vmem:[%s686_s7] sm:$0xff]  ;;  %s435_s7 = sshll.u32 %s549_s5, 4  ;;  %s436_s7 = int_to_ptr.vmem [resolvable:$true] %s435_s7 }
   0xe   :  { %v394_v11 = vmul.f32 -0.5, %v391_v0  ;;  %s526_s22 = scalar_lea.vmem %s436_s7, 256  ;;  %p531_p1 = scmp.lt.s32.totalorder %s436_s7, %s436_s7 }
   0xf   :  { %177 = vperm.xlu0 %516, %v167_v13   ;;  %p527_p0 = scmp.ne.s32.totalorder %s436_s7, %s526_s22  ;;  %p532_p2 = scmp.lt.s32.totalorder %s526_s22, %s526_s22 }
  0x10   :  { %172 = vperm.xlu1 %517, %v166_v14   ;;  %v395_v13 = vmul.f32 %v394_v11, %v391_v0 }
  0x11   :  { %p533_p3 = por %p532_p2, %p531_p1 }
  0x13   :  { %303 = vperm.xlu0 %516, %v295_v15   ;;  %p534_p4 = pnand %p533_p3, %p527_p0 }
  0x14   :  { %298 = vperm.xlu1 %517, %v294_v16  }
  0x7d   :  { %v58_v18 = vpop.permute.xlu0 %57 }
  0x7f   :  { %v48_v20 = vpop.permute.xlu1 %47 }
  0x82   :  { %v53_v24 = vpop.permute.xlu0 %52 }
  0x83   :  { %v43_v29 = vpop.permute.xlu1 %42 }
  0x86   :  { %v188_v38 = vpop.permute.xlu0 %187 }
  0x87   :  { %v183_v40 = vpop.permute.xlu1 %182 }
  0x8a   :  { %v178_v44 = vpop.permute.xlu0 %177 }
  0x8b   :  { %v173_v49 = vpop.permute.xlu1 %172 }
  0x8e   :  { %v304_v55 = vpop.permute.xlu0 %303 }
  0x8f   :  { %v299_v63 = vpop.permute.xlu1 %298 }
  0xc6   :  { %v483_v19 = vpop.f32.mrf.mxu0 }
  0xc7   :  { %v145_v26 = vadd.f32 %v483_v19, %v48_v20 }
  0xc8   :  { %v139_v21 = vpop.f32.mrf.mxu0 }
  0xc9   :  { %v140_v30 = vadd.f32 %v139_v21, %v43_v29  ;;  %v159_v32 = vmax.f32 %v145_v26, 0.0 }
  0xca   :  { %v486_v22 = vpop.f32.mrf.mxu0 }
  0xcb   :  { %v155_v23 = vadd.f32 %v486_v22, %v58_v18  ;;  %v158_v33 = vmax.f32 %v140_v30, 0.0 }
  0xcc   :  { %v149_v25 = vpop.f32.mrf.mxu0 }
  0xcd   :  { %v161_v27 = vmax.f32 %v155_v23, 0.0  ;;  %v150_v28 = vadd.f32 %v149_v25, %v53_v24 }
  0xcf   :  { %v160_v31 = vmax.f32 %v150_v28, 0.0  ;;  %487 = vmatprep.subr.mxu1 %v161_v27 }
  0xd0   :  { %488 = vmatpush3.msra.mxu1 %v161_v27 }
  0xd1   :  { %489 = vmatprep.subr.mxu1 %v160_v31 }
  0xd2   :  { %490 = vmatpush3.msra.mxu1 %v160_v31 }
  0xd3   :  { %491 = vmatprep.subr.mxu1 %v159_v32 }
  0xd4   :  { %492 = vmatpush3.msra.mxu1 %v159_v32 }
  0xd5   :  { %493 = vmatprep.subr.mxu1 %v158_v33 }
  0xd6   :  { %494 = vmatpush3.msra.mxu1 %v158_v33 }
  0xd7   :  { %496 = vmatmul.mubr.msk.f32.vlgmr.msra.gmra.mxu1 %vm190_vm1, %v163_v34 }
  0xd8   :  { %498 = vmatprep.mubr.msk.f32.mxu1 %vm190_vm1, %v164_v35 }
  0xdb   :  { %499 = vmatmul.mubr.msk.f32.gmra.mxu1 %vm190_vm1, %v165_v36 }
 0x197   :  { %v497_v39 = vpop.f32.mrf.mxu1 }
 0x198   :  { %v275_v46 = vadd.f32 %v497_v39, %v178_v44 }
 0x199   :  { %v269_v41 = vpop.f32.mrf.mxu1 }
 0x19a   :  { %v270_v50 = vadd.f32 %v269_v41, %v173_v49  ;;  %v289_v52 = vmax.f32 %v275_v46, 0.0 }
 0x19b   :  { %v500_v42 = vpop.f32.mrf.mxu1 }
 0x19c   :  { %v285_v43 = vadd.f32 %v500_v42, %v188_v38  ;;  %v288_v53 = vmax.f32 %v270_v50, 0.0 }
 0x19d   :  { %v279_v45 = vpop.f32.mrf.mxu1 }
 0x19e   :  { %v291_v47 = vmax.f32 %v285_v43, 0.0  ;;  %v280_v48 = vadd.f32 %v279_v45, %v183_v40 }
 0x1a0   :  { %v290_v51 = vmax.f32 %v280_v48, 0.0  ;;  %501 = vmatprep.subr.mxu0 %v291_v47 }
 0x1a1   :  { %502 = vmatpush3.msra.mxu0 %v291_v47 }
 0x1a2   :  { %503 = vmatprep.subr.mxu0 %v290_v51 }
 0x1a3   :  { %504 = vmatpush3.msra.mxu0 %v290_v51 }
 0x1a4   :  { %505 = vmatprep.subr.mxu0 %v289_v52 }
 0x1a5   :  { %506 = vmatpush3.msra.mxu0 %v289_v52 }
 0x1a6   :  { %507 = vmatprep.subr.mxu0 %v288_v53 }
 0x1a7   :  { %508 = vmatpush3.msra.mxu0 %v288_v53 }
 0x1a8   :  { %510 = vmatmul.mubr.msk.f32.vlgmr.msra.gmra.mxu0 %vm190_vm1, %v293_v54 }
 0x268   :  { %v511_v56 = vpop.f32.mrf.mxu0 }
 0x269   :  { %v384_v57 = vadd.f32 %v511_v56, %v304_v55 }
 0x26a   :  { %v378_v61 = vpop.f32.mrf.mxu0 }
 0x26b   :  { %v387_v58 = vmax.f32 %v384_v57, -20.0  ;;  %v379_v1 = vadd.f32 %v378_v61, %v299_v63 }
 0x26d   :  { %v388_v59 = vmin.f32 %v387_v58, 2.0 }
 0x26f   :  { %v389_v60 = vmul.f32 1.442695, %v388_v59  ;;  %v396_v17 = vsub.f32 %v395_v13, %v388_v59 }
 0x271   :  { %518 = vpow2.f32 %v389_v60  ;;  %v456_v24 = vadd.f32 -2.305233, %v396_v17 }
 0x27e   :  { %v519_v62 = vpop.eup %518 }
 0x27f   :  { %v392_v2 = vmul.f32 %v519_v62, %v391_v0 }
 0x281   :  { %v393_v3 = vadd.f32 %v392_v2, %v379_v1 }
 0x283   :  { %v400_v4 = vmul.f32 -2.0, %v393_v3  ;;  %520 = vtanh.f32 %v393_v3  ;;  %v398_v21 = vmul.f32 2.0, %v393_v3 }
 0x285   :  { %v404_v5 = vand.u32 2147483647, %v400_v4  ;;  %v401_v20 = vmax.f32 %v400_v4, 0.0  ;;  %vm402_vm3 = vcmp.ne.f32.partialorder %v400_v4, %v400_v4  ;;  %v399_v26 = vadd.f32 %v456_v24, %v398_v21 }
 0x287   :  { %v405_v6 = vsub.f32 0.0, %v404_v5 }
 0x289   :  { %v406_v7 = vmul.f32 1.442695, %v405_v6 }
 0x28b   :  { %522 = vpow2.f32 %v406_v7 }
 0x290   :  { %v521_v8 = vpop.eup %520 }
 0x291   :  { %428 = vst [vmem:[#allocation2] sm:$0xff] %v521_v8 }
 0x298   :  { %v523_v9 = vpop.eup %522 }
 0x299   :  { %v408_v10 = vadd.f32 1.0, %v523_v9  ;;  %v411_v12 = vmul.f32 -0.5, %v523_v9  ;;  %v414_v15 = vand.u32 2147483647, %v523_v9 }
 0x29b   :  { %524 = vlog2.f32 %v408_v10  ;;  %v412_v14 = vadd.f32 1.0, %v411_v12  ;;  %vm415_vm2 = vcmp.lt.f32.partialorder %v414_v15, 0.0004427343 }
 0x29d   :  { %v413_v19 = vmul.f32 %v523_v9, %v412_v14 }
 0x2a8   :  { %v525_v16 = vpop.eup %524 }
 0x2a9   :  { %v410_v18 = vmul.f32 0.6931472, %v525_v16 }
 0x2ab   :  { %v416_v22 = vsel %vm415_vm2, %v413_v19, %v410_v18 }
 0x2ac   :  { %v417_v23 = vadd.f32 %v416_v22, %v401_v20 }
 0x2ae   :  { %v418_v25 = vsel %vm402_vm3, %v400_v4, %v417_v23 }
 0x2af   :  { %v419_v27 = vmul.f32 2.0, %v418_v25 }
 0x2b1   :  { %v420_v28 = vadd.f32 %v419_v27, %v399_v26 }
 0x2b3   :  { %v421_v29 = vrot.slane %v420_v28, 4 }
 0x2b5   :  { %v422_v30 = vadd.f32 %v421_v29, %v420_v28 }
 0x2b7   :  { %v423_v31 = vrot.slane %v422_v30, 2 }
 0x2b9   :  { %v424_v32 = vadd.f32 %v423_v31, %v422_v30 }
 0x2bb   :  { %v425_v33 = vrot.slane %v424_v32, 1 }
 0x2bd   :  { %v426_v34 = vadd.f32 %v425_v33, %v424_v32 }
 0x2bf   :  { %429 = vst [vmem:[#allocation2 + $0x8] sm:$0x1] %v426_v34 }
 0x2c0   :  { %537 = shalt.err (!%p534_p4)
}
 0x2c1   :  { %s550_s23 = smov 128   ;;  %s551_s24 = smov 8  }
 0x2c2   :  { %441 = dma.vmem_to_hbm [thread:$0]  %s436_s7, 256, %s687_s8, [#allocation3], %s550_s23, %s550_s23, %s551_s24  }
 0x2c3   :  { %546 = dma.done.wait [#allocation3], 256  }
 0x2c4   :  { %547 = vsyncadd [#allocation3], 4294967040 }
 0x2c5   :  { %445 = vsyncpa [#allocation3], 1 }

</bundles_post_ra>
